<compile_context>
chip_gen: v7x
topology: tpu7x:2x2x1
jax: 0.10.0
libtpu: 0.0.40
codegen_flags: <defaults>
</compile_context>

<pallas_src>
import jax
import jax.numpy as jnp
from jax.experimental import pallas as pl
from jax.experimental.pallas import tpu as pltpu


def _round_up(n: int, m: int) -> int:
    return ((n + m - 1) // m) * m


def _mlp4_kernel(x_ref, w_ref, o_ref):
    # One MXU matmul per batch tile; accumulate in f32, cast on store.
    o_ref[...] = jnp.dot(
        x_ref[...], w_ref[...], preferred_element_type=jnp.float32
    ).astype(o_ref.dtype)


def _mlp4_tiles(x, w, *, rows, block_b, out_dtype):
    """Run the single-matmul kernel over the first `rows` rows of x.

    `rows` must be a multiple of `block_b`.  `x` may have MORE rows than `rows`;
    the grid simply never visits the tail, which lets the caller avoid copying /
    padding the full activation tensor in HBM.
    """
    in_f = x.shape[1]
    out_p = w.shape[1]
    num_blocks = rows // block_b
    assert num_blocks * block_b == rows

    return pl.pallas_call(
        _mlp4_kernel,
        out_shape=jax.ShapeDtypeStruct((rows, out_p), out_dtype),
        grid_spec=pltpu.PrefetchScalarGridSpec(
            num_scalar_prefetch=0,
            grid=(num_blocks,),
            in_specs=[
                # x: one batch tile per grid step (pipelined / double-buffered).
                pl.BlockSpec((block_b, in_f), lambda i: (i, 0)),
                # Collapsed weight: grid-invariant -> DMA'd into VMEM once
                # (revisit detection avoids per-step re-fetch).  pl.Buffered(1)
                # would shave one redundant ~0.4 MiB buffer; skipped as minor.
                pl.BlockSpec((in_f, out_p), lambda i: (0, 0)),
            ],
            out_specs=pl.BlockSpec((block_b, out_p), lambda i: (i, 0)),
        ),
        compiler_params=pltpu.CompilerParams(
            # Batch axis is independent -> megacore sharding on v7x; no-op on
            # the single-TC v5e/v6e.
            dimension_semantics=("parallel",),
            # Default tiles use ~15 MiB; safe on v5e/v6e/v7x.
            vmem_limit_bytes=32 * 1024 * 1024,
        ),
    )(x, w)


def mlp4_forward(x, w1, w2, w3, w4, *, block_b=2048, pad_out_lanes=True):
    """Forward pass of MLP4Layer.

    Args:
      x:       [B, in_features] activations (f32 or bf16; compute dtype == x.dtype).
      w1..w4:  PyTorch-layout Linear weights, i.e. [out, in].
      block_b: batch-tile row budget for 4-byte dtypes (doubled for 2-byte dtypes,
               so bytes-per-tile / DMA time stay the same).
      pad_out_lanes: zero-pad the collapsed weight's output dim to a multiple of
               128 so output stores are lane-dense (unmasked vst).

    Returns:
      y: [B, out_features] in x.dtype.
    """
    B, in_f = x.shape
    out_f = w4.shape[0]
    out_dtype = x.dtype

    # Collapse the bias-free, activation-free chain into one [in_f, out_f] matrix.
    # (Intermediates are 64x32 / 64x32 / 768x32 -- negligible.)  Done in the
    # weights' dtype (f32) then cast to the MXU input dtype.
    w_combined = w1.T @ (w2.T @ (w3.T @ w4.T))
    w_combined = w_combined.astype(x.dtype)

    # Lane-dense output stores: pad out_f up to a multiple of 128 with zero
    # columns; slice them off the (small) result at the end.
    out_p = _round_up(out_f, 128) if pad_out_lanes else out_f
    if out_p != out_f:
        w_combined = jnp.pad(w_combined, ((0, 0), (0, out_p - out_f)))

    # Sublane granularity: 8 rows for 4-byte dtypes, 16 for 2-byte (packing).
    itemsize = jnp.dtype(x.dtype).itemsize
    sublane = 16 if itemsize == 2 else 8
    if itemsize == 2:
        block_b *= 2  # same bytes per tile as the f32 default

    # Clamp the tile: never larger than the sublane-rounded batch, always a
    # sublane multiple.  For large B the default (2048 f32 / 4096 bf16 rows)
    # keeps 2x x-buffers + out + weight at ~15 MiB and the grid long enough to
    # pipeline and to feed both v7x TensorCores.
    block_b = max(sublane, min(block_b, _round_up(B, sublane)))
    block_b = _round_up(block_b, sublane)

    # Ragged-batch handling without padding/copying the whole x in HBM:
    #   full tiles -> one pipelined call over the first num_full*block_b rows,
    #   tail       -> one tiny single-tile call, padded only to the sublane multiple.
    num_full = B // block_b
    rem = B - num_full * block_b

    pieces = []
    if num_full > 0:
        pieces.append(
            _mlp4_tiles(x, w_combined, rows=num_full * block_b,
                        block_b=block_b, out_dtype=out_dtype)
        )
    if rem > 0:
        rem_p = _round_up(rem, sublane)
        x_tail = x[num_full * block_b:]
        if rem_p != rem:
            x_tail = jnp.pad(x_tail, ((0, rem_p - rem), (0, 0)))
        y_tail = _mlp4_tiles(x_tail, w_combined, rows=rem_p,
                             block_b=rem_p, out_dtype=out_dtype)
        pieces.append(y_tail[:rem])

    y = pieces[0] if len(pieces) == 1 else jnp.concatenate(pieces, axis=0)
    if out_p != out_f:
        y = y[:, :out_f]
    return y


if __name__ == "__main__":
    # Module defaults: in_features=768, hidden=64, out_features=32, bias=False, sigma=1
    in_features, hidden, out_features, sigma = 768, 64, 32, 1.0
    batch = 24  # deliberately not a "nice" tile size to exercise the tail path

    key = jax.random.PRNGKey(0)
    kx, k1, k2, k3, k4 = jax.random.split(key, 5)

    x = jax.random.normal(kx, (batch, in_features), dtype=jnp.float32)
    # Deterministic normal(0, sigma) init, PyTorch Linear weight layout [out, in].
    w1 = sigma * jax.random.normal(k1, (hidden, in_features), dtype=jnp.float32)
    w2 = sigma * jax.random.normal(k2, (hidden, hidden), dtype=jnp.float32)
    w3 = sigma * jax.random.normal(k3, (hidden, hidden), dtype=jnp.float32)
    w4 = sigma * jax.random.normal(k4, (out_features, hidden), dtype=jnp.float32)

    # Pure-JAX layer-by-layer reference (matches the PyTorch forward; the collapsed
    # kernel differs only in summation order, covered by the tolerance below).
    y_ref = (((x @ w1.T) @ w2.T) @ w3.T) @ w4.T

    # 1) f32, default tiling (block clamps to the small batch -> single tile).
    y32 = jax.block_until_ready(mlp4_forward(x, w1, w2, w3, w4))
    assert y32.shape == (batch, out_features)
    rel32 = jnp.linalg.norm(y32 - y_ref) / jnp.linalg.norm(y_ref)
    assert float(rel32) < 1e-4, f"f32 rel err too high: {float(rel32)}"

    # 2) f32, small tile -> full-tile call + ragged-tail call (no full-x padding).
    y32b = jax.block_until_ready(mlp4_forward(x, w1, w2, w3, w4, block_b=16))
    rel32b = jnp.linalg.norm(y32b - y_ref) / jnp.linalg.norm(y_ref)
    assert float(rel32b) < 1e-4, f"f32 tiled rel err too high: {float(rel32b)}"

    # 3) bf16 activations end-to-end (no wrapper-side cast of an f32 x), small
    #    tile to exercise the bf16 two-call path.  Tolerance is loose because the
    #    collapsed weight has a wider dynamic range than the per-layer weights.
    xb = x.astype(jnp.bfloat16)
    ybf = jax.block_until_ready(mlp4_forward(xb, w1, w2, w3, w4, block_b=8))
    assert ybf.shape == (batch, out_features)
    relbf = jnp.linalg.norm(ybf.astype(jnp.float32) - y_ref) / jnp.linalg.norm(y_ref)
    assert float(relbf) < 3e-2, f"bf16 rel err too high: {float(relbf)}"

    print("KERNEL_OK")
</pallas_src>

<mosaic_0001>
module attributes {stable_mosaic.version = 11 : i64} {
  func.func @_mlp4_kernel(%arg0: i32, %arg1: memref<24x768xf32, #tpu.memory_space<vmem>>, %arg2: memref<768x128xf32, #tpu.memory_space<vmem>>, %arg3: memref<24x128xf32, #tpu.memory_space<vmem>>) attributes {dimension_semantics = [#tpu.dimension_semantics<parallel>], iteration_bounds = array<i64: 1>, scalar_prefetch = 0 : i64, scratch_operands = 0 : i64, tpu.core_type = #tpu.core_type<tc>, window_params = [{transform_indices = @transform_0, window_bounds = array<i64: 24, 768>}, {pipeline_mode = #tpu.pipeline_mode<synchronous>, transform_indices = @transform_1, window_bounds = array<i64: 768, 128>}, {transform_indices = @transform_2, window_bounds = array<i64: 24, 128>}]} {
    %c0 = arith.constant 0 : index
    %c0_0 = arith.constant 0 : index
    %0 = vector.load %arg1[%c0, %c0_0] : memref<24x768xf32, #tpu.memory_space<vmem>>, vector<24x768xf32>
    %c0_1 = arith.constant 0 : index
    %c0_2 = arith.constant 0 : index
    %1 = vector.load %arg2[%c0_1, %c0_2] : memref<768x128xf32, #tpu.memory_space<vmem>>, vector<768x128xf32>
    %cst = arith.constant dense<0.000000e+00> : vector<24x128xf32>
    %2 = tpu.matmul %0, %1, %cst {dimension_numbers = #tpu.dot_dimension_numbers<[1], [0], [0], [1], [0, 0, 1, 1], [], []>} : vector<24x768xf32>, vector<768x128xf32>, vector<24x128xf32> -> vector<24x128xf32>
    %c0_3 = arith.constant 0 : index
    %c0_4 = arith.constant 0 : index
    %3 = vector.load %arg3[%c0_3, %c0_4] : memref<24x128xf32, #tpu.memory_space<vmem>>, vector<24x128xf32>
    tpu.vector_store %arg3[%c0_3, %c0_4], %2 {strides = array<i32>} : memref<24x128xf32, #tpu.memory_space<vmem>>, vector<24x128xf32>,
    return
  }
  func.func @transform_0(%arg0: i32) -> (i32, i32) {
    %c0_i32 = arith.constant 0 : i32
    %c0_i32_0 = arith.constant 0 : i32
    return %arg0, %c0_i32 : i32, i32
  }
  func.func @transform_1(%arg0: i32) -> (i32, i32) {
    %c0_i32 = arith.constant 0 : i32
    %c0_i32_0 = arith.constant 0 : i32
    %c0_i32_1 = arith.constant 0 : i32
    return %c0_i32, %c0_i32_0 : i32, i32
  }
  func.func @transform_2(%arg0: i32) -> (i32, i32) {
    %c0_i32 = arith.constant 0 : i32
    %c0_i32_0 = arith.constant 0 : i32
    return %arg0, %c0_i32 : i32, i32
  }
}

</mosaic_0001>

<bundles_post_ra>
// kernel: tpu_custom_call.1
= control target key start
LH: loop header
LB: loop body
LE: loop exit
PB: predicated region body
PF: predicated region fallthrough
CT: control target
= control target key end

     0   :  { %7 = vsyncpa [#allocation3], 0  ;;  %s793_s0 = inlined_call_operand.hbm [shape: f32[24,768], index: 0, kind: input, shape index: {}]   ;;  %s794_s1 = inlined_call_operand.hbm [shape: f32[768,128], index: 1, kind: input, shape index: {}]   ;;  %s795_s2 = inlined_call_operand.hbm [shape: f32[24,128], index: 2, kind: output, shape index: {}]  }
   0x1   :  { %8 = vsyncpa [#allocation6], 0 }
   0x2   :  { %9 = vsyncpa [#allocation4], 0  ;;  %s729_s9 = smov [#allocation2]   ;;  %s657_s13 = scalar_lea.hbm %s793_s0, 2304 }
   0x3   :  { %s15_s10 = sshll.u32 %s729_s9, 4  ;;  %p658_p0 = scmp.ne.s32.totalorder %s793_s0, %s657_s13  ;;  %s16_s10 = int_to_ptr.vmem [resolvable:$true] %s15_s10 }
   0x4   :  { %p661_p1 = scmp.lt.u32.totalorder %s657_s13, %s793_s0 }
   0x6   :  { %p663_p2 = pnand %p661_p1, %p658_p0 }
   0x8   :  { %666 = shalt.err (!%p663_p2)
}
   0x9   :  { %s667_s18 = scalar_lea.vmem %s16_s10, 2304  ;;  %p672_p4 = scmp.lt.s32.totalorder %s16_s10, %s16_s10 }
   0xa   :  { %p668_p3 = scmp.ne.s32.totalorder %s16_s10, %s667_s18  ;;  %p673_p5 = scmp.lt.s32.totalorder %s667_s18, %s667_s18 }
   0xc   :  { %p674_p6 = por %p673_p5, %p672_p4 }
   0xe   :  { %p675_p7 = pnand %p674_p6, %p668_p3 }
  0x10   :  { %678 = shalt.err (!%p675_p7)
}
  0x11   :  { %s730_s19 = smov 768   ;;  %s731_s20 = smov 48  }
  0x12   :  { %21 = dma.hbm_to_vmem [thread:$0]  %s793_s0, 2304, %s16_s10, [#allocation3], %s730_s19, %s730_s19, %s731_s20  }
  0x13   :  { %s732_s23 = smov [#allocation5]   ;;  %s679_s27 = scalar_lea.hbm %s794_s1, 12288 }
  0x14   :  { %s27_s24 = sshll.u32 %s732_s23, 4  ;;  %p680_p8 = scmp.ne.s32.totalorder %s794_s1, %s679_s27  ;;  %s28_s24 = int_to_ptr.vmem [resolvable:$true] %s27_s24 }
  0x15   :  { %p683_p9 = scmp.lt.u32.totalorder %s679_s27, %s794_s1 }
  0x17   :  { %p685_p10 = pnand %p683_p9, %p680_p8 }
  0x19   :  { %688 = shalt.err (!%p685_p10)
}
  0x1a   :  { %s689_s4 = scalar_lea.vmem %s28_s24, 12288  ;;  %p694_p12 = scmp.lt.s32.totalorder %s28_s24, %s28_s24 }
  0x1b   :  { %p690_p11 = scmp.ne.s32.totalorder %s28_s24, %s689_s4  ;;  %p695_p13 = scmp.lt.s32.totalorder %s689_s4, %s689_s4 }
  0x1d   :  { %p696_p0 = por %p695_p13, %p694_p12 }
  0x1f   :  { %p697_p1 = pnand %p696_p0, %p690_p11 }
  0x21   :  { %700 = shalt.err (!%p697_p1)
}
  0x22   :  { %s733_s0 = smov 128   ;;  %s734_s5 = smov 8  }
  0x23   :  { %33 = dma.hbm_to_vmem [thread:$0]  %s794_s1, 12288, %s28_s24, [#allocation6], %s733_s0, %s733_s0, %s734_s5  }
  0x24   :  { %723 = dma.done.wait [#allocation3], 2304  }
  0x25   :  { %724 = vsyncadd [#allocation3], 4294964992 }
  0x26   :  { %725 = dma.done.wait [#allocation6], 12288  }
  0x27   :  { %726 = vsyncadd [#allocation6], 4294955008  ;;  %v74_v0 = vld [vmem:[#allocation5 + $0x80] sm:$0xff]  ;;  %v75_v1 = vld [vmem:[#allocation5 + $0x88] sm:$0xff]  ;;  %s735_s1 = smov [#allocation7]  }
  0x28   :  { %v106_v2 = vld [vmem:[#allocation5 + $0x180] sm:$0xff]  ;;  %v538_v3 = vpack.c.bf16 %v75_v1, %v74_v0  ;;  %v107_v4 = vld [vmem:[#allocation5 + $0x188] sm:$0xff]  ;;  %v76_v11 = vld [vmem:[#allocation5 + $0x90] sm:$0xff]  ;;  %s402_s8 = sshll.u32 %s735_s1, 4  ;;  %s403_s8 = int_to_ptr.vmem [resolvable:$true] %s402_s8 }
  0x29   :  { %v58_v5 = vld [vmem:[#allocation5] sm:$0xff]  ;;  %v59_v6 = vld [vmem:[#allocation5 + $0x8] sm:$0xff]  ;;  %v570_v7 = vpack.c.bf16 %v107_v4, %v106_v2  ;;  %v77_v13 = vld [vmem:[#allocation5 + $0x98] sm:$0xff]  ;;  %s701_s9 = scalar_lea.vmem %s403_s8, 384  ;;  %p706_p3 = scmp.lt.s32.totalorder %s403_s8, %s403_s8 }
  0x2a   :  { %v540_v8 = vpack.c.bf16 %v59_v6, %v58_v5  ;;  %v90_v9 = vld [vmem:[#allocation5 + $0x100] sm:$0xff]  ;;  %v91_v10 = vld [vmem:[#allocation5 + $0x108] sm:$0xff]  ;;  %539 = vmatprep.subr.bf16.mxu0 %v538_v3  ;;  %v108_v14 = vld [vmem:[#allocation5 + $0x190] sm:$0xff]  ;;  %v542_v16 = vpack.c.bf16 %v77_v13, %v76_v11  ;;  %p702_p2 = scmp.ne.s32.totalorder %s403_s8, %s701_s9  ;;  %p707_p4 = scmp.lt.s32.totalorder %s701_s9, %s701_s9 }
  0x2b   :  { %v572_v12 = vpack.c.bf16 %v91_v10, %v90_v9  ;;  %v109_v15 = vld [vmem:[#allocation5 + $0x198] sm:$0xff]  ;;  %571 = vmatprep.subr.bf16.mxu1 %v570_v7  ;;  %v60_v18 = vld [vmem:[#allocation5 + $0x10] sm:$0xff]  ;;  %v78_v23 = vld [vmem:[#allocation5 + $0xa0] sm:$0xff] }
  0x2c   :  { %541 = vmatpush3.bf16.msra.mxu0 %v540_v8  ;;  %v574_v17 = vpack.c.bf16 %v109_v15, %v108_v14  ;;  %v61_v19 = vld [vmem:[#allocation5 + $0x18] sm:$0xff]  ;;  %v92_v20 = vld [vmem:[#allocation5 + $0x110] sm:$0xff]  ;;  %v79_v24 = vld [vmem:[#allocation5 + $0xa8] sm:$0xff]  ;;  %p708_p5 = por %p707_p4, %p706_p3 }
  0x2d   :  { %573 = vmatpush3.bf16.msra.mxu1 %v572_v12  ;;  %v544_v21 = vpack.c.bf16 %v61_v19, %v60_v18  ;;  %v93_v22 = vld [vmem:[#allocation5 + $0x118] sm:$0xff]  ;;  %543 = vmatprep.subr.bf16.mxu0 %v542_v16  ;;  %v546_v26 = vpack.c.bf16 %v79_v24, %v78_v23  ;;  %v110_v27 = vld [vmem:[#allocation5 + $0x1a0] sm:$0xff]  ;;  %v111_v28 = vld [vmem:[#allocation5 + $0x1a8] sm:$0xff] }
  0x2e   :  { %575 = vmatprep.subr.bf16.mxu1 %v574_v17  ;;  %v576_v25 = vpack.c.bf16 %v93_v22, %v92_v20  ;;  %v62_v29 = vld [vmem:[#allocation5 + $0x20] sm:$0xff]  ;;  %v578_v30 = vpack.c.bf16 %v111_v28, %v110_v27  ;;  %v63_v31 = vld [vmem:[#allocation5 + $0x28] sm:$0xff]  ;;  %v80_v35 = vld [vmem:[#allocation5 + $0xb0] sm:$0xff]  ;;  %p709_p6 = pnand %p708_p5, %p702_p2 }
  0x2f   :  { %v94_v32 = vld [vmem:[#allocation5 + $0x120] sm:$0xff]  ;;  %v95_v33 = vld [vmem:[#allocation5 + $0x128] sm:$0xff]  ;;  %v548_v34 = vpack.c.bf16 %v63_v31, %v62_v29  ;;  %v81_v36 = vld [vmem:[#allocation5 + $0xb8] sm:$0xff] }
  0x30   :  { %545 = vmatpush3.bf16.msra.mxu0 %v544_v21  ;;  %v112_v37 = vld [vmem:[#allocation5 + $0x1b0] sm:$0xff]  ;;  %v580_v38 = vpack.c.bf16 %v95_v33, %v94_v32  ;;  %v550_v39 = vpack.c.bf16 %v81_v36, %v80_v35  ;;  %v113_v40 = vld [vmem:[#allocation5 + $0x1b8] sm:$0xff]  ;;  %v82_v46 = vld [vmem:[#allocation5 + $0xc0] sm:$0xff] }
  0x31   :  { %577 = vmatpush3.bf16.msra.mxu1 %v576_v25  ;;  %547 = vmatprep.subr.bf16.mxu0 %v546_v26  ;;  %v64_v41 = vld [vmem:[#allocation5 + $0x30] sm:$0xff]  ;;  %v65_v42 = vld [vmem:[#allocation5 + $0x38] sm:$0xff]  ;;  %v582_v43 = vpack.c.bf16 %v113_v40, %v112_v37  ;;  %v83_v47 = vld [vmem:[#allocation5 + $0xc8] sm:$0xff] }
  0x32   :  { %579 = vmatprep.subr.bf16.mxu1 %v578_v30  ;;  %v96_v44 = vld [vmem:[#allocation5 + $0x130] sm:$0xff]  ;;  %v97_v45 = vld [vmem:[#allocation5 + $0x138] sm:$0xff]  ;;  %v114_v48 = vld [vmem:[#allocation5 + $0x1c0] sm:$0xff]  ;;  %v552_v50 = vpack.c.bf16 %v65_v42, %v64_v41  ;;  %v554_v52 = vpack.c.bf16 %v83_v47, %v82_v46 }
  0x33   :  { %v115_v49 = vld [vmem:[#allocation5 + $0x1c8] sm:$0xff]  ;;  %v584_v51 = vpack.c.bf16 %v97_v45, %v96_v44  ;;  %v66_v53 = vld [vmem:[#allocation5 + $0x40] sm:$0xff]  ;;  %v84_v58 = vld [vmem:[#allocation5 + $0xd0] sm:$0xff] }
  0x34   :  { %549 = vmatpush3.bf16.msra.mxu0 %v548_v34  ;;  %v67_v54 = vld [vmem:[#allocation5 + $0x48] sm:$0xff]  ;;  %v98_v55 = vld [vmem:[#allocation5 + $0x140] sm:$0xff]  ;;  %v586_v56 = vpack.c.bf16 %v115_v49, %v114_v48  ;;  %v85_v59 = vld [vmem:[#allocation5 + $0xd8] sm:$0xff] }
  0x35   :  { %581 = vmatpush3.bf16.msra.mxu1 %v580_v38  ;;  %551 = vmatprep.subr.bf16.mxu0 %v550_v39  ;;  %v99_v57 = vld [vmem:[#allocation5 + $0x148] sm:$0xff]  ;;  %v116_v60 = vld [vmem:[#allocation5 + $0x1d0] sm:$0xff]  ;;  %v117_v61 = vld [vmem:[#allocation5 + $0x1d8] sm:$0xff]  ;;  %v556_v62 = vpack.c.bf16 %v67_v54, %v66_v53  ;;  %v558_v0 = vpack.c.bf16 %v85_v59, %v84_v58 }
  0x36   :  { %583 = vmatprep.subr.bf16.mxu1 %v582_v43  ;;  %v588_v63 = vpack.c.bf16 %v99_v57, %v98_v55  ;;  %v68_v1 = vld [vmem:[#allocation5 + $0x50] sm:$0xff]  ;;  %v69_v2 = vld [vmem:[#allocation5 + $0x58] sm:$0xff]  ;;  %v590_v4 = vpack.c.bf16 %v117_v61, %v116_v60  ;;  %v86_v6 = vld [vmem:[#allocation5 + $0xe0] sm:$0xff] }
  0x37   :  { %v100_v3 = vld [vmem:[#allocation5 + $0x150] sm:$0xff]  ;;  %v101_v5 = vld [vmem:[#allocation5 + $0x158] sm:$0xff]  ;;  %v87_v7 = vld [vmem:[#allocation5 + $0xe8] sm:$0xff]  ;;  %v560_v10 = vpack.c.bf16 %v69_v2, %v68_v1 }
  0x38   :  { %553 = vmatpush3.bf16.msra.mxu0 %v552_v50  ;;  %v118_v8 = vld [vmem:[#allocation5 + $0x1e0] sm:$0xff]  ;;  %v119_v9 = vld [vmem:[#allocation5 + $0x1e8] sm:$0xff]  ;;  %v592_v13 = vpack.c.bf16 %v101_v5, %v100_v3  ;;  %v562_v14 = vpack.c.bf16 %v87_v7, %v86_v6  ;;  %v41_v16 = vld [vmem:[#allocation2 + $0x8] sm:$0xff] }
  0x39   :  { %585 = vmatpush3.bf16.msra.mxu1 %v584_v51  ;;  %555 = vmatprep.subr.bf16.mxu0 %v554_v52  ;;  %v70_v11 = vld [vmem:[#allocation5 + $0x60] sm:$0xff]  ;;  %v71_v12 = vld [vmem:[#allocation5 + $0x68] sm:$0xff]  ;;  %v594_v18 = vpack.c.bf16 %v119_v9, %v118_v8  ;;  %v88_v20 = vld [vmem:[#allocation5 + $0xf0] sm:$0xff] }
  0x3a   :  { %587 = vmatprep.subr.bf16.mxu1 %v586_v56  ;;  %v102_v15 = vld [vmem:[#allocation5 + $0x160] sm:$0xff]  ;;  %v43_v17 = vld [vmem:[#allocation2 + $0x18] sm:$0xff]  ;;  %v89_v21 = vld [vmem:[#allocation5 + $0xf8] sm:$0xff]  ;;  %218 = vmatprep.mubr.f32.mxu0 %v41_v16  ;;  %v564_v24 = vpack.c.bf16 %v71_v12, %v70_v11 }
  0x3b   :  { %v103_v19 = vld [vmem:[#allocation5 + $0x168] sm:$0xff]  ;;  %v120_v22 = vld [vmem:[#allocation5 + $0x1f0] sm:$0xff]  ;;  %v121_v23 = vld [vmem:[#allocation5 + $0x1f8] sm:$0xff]  ;;  %298 = vmatprep.mubr.f32.mxu1 %v43_v17  ;;  %v566_v26 = vpack.c.bf16 %v89_v21, %v88_v20 }
  0x3c   :  { %557 = vmatpush3.bf16.msra.mxu0 %v556_v62  ;;  %v596_v25 = vpack.c.bf16 %v103_v19, %v102_v15  ;;  %v72_v27 = vld [vmem:[#allocation5 + $0x70] sm:$0xff]  ;;  %v73_v28 = vld [vmem:[#allocation5 + $0x78] sm:$0xff]  ;;  %v598_v30 = vpack.c.bf16 %v121_v23, %v120_v22  ;;  %v138_v32 = vld [vmem:[#allocation5 + $0x280] sm:$0xff] }
  0x3d   :  { %589 = vmatpush3.bf16.msra.mxu1 %v588_v63  ;;  %559 = vmatprep.subr.bf16.mxu0 %v558_v0  ;;  %v104_v29 = vld [vmem:[#allocation5 + $0x170] sm:$0xff]  ;;  %v105_v31 = vld [vmem:[#allocation5 + $0x178] sm:$0xff]  ;;  %v139_v33 = vld [vmem:[#allocation5 + $0x288] sm:$0xff]  ;;  %v568_v34 = vpack.c.bf16 %v73_v28, %v72_v27 }
  0x3e   :  { %591 = vmatprep.subr.bf16.mxu1 %v590_v4  ;;  %v600_v35 = vpack.c.bf16 %v105_v31, %v104_v29  ;;  %v602_v36 = vpack.c.bf16 %v139_v33, %v138_v32  ;;  %v122_v37 = vld [vmem:[#allocation5 + $0x200] sm:$0xff]  ;;  %v123_v38 = vld [vmem:[#allocation5 + $0x208] sm:$0xff]  ;;  %v140_v39 = vld [vmem:[#allocation5 + $0x290] sm:$0xff] }
  0x3f   :  { %v141_v40 = vld [vmem:[#allocation5 + $0x298] sm:$0xff]  ;;  %v40_v41 = vld [vmem:[#allocation2] sm:$0xff]  ;;  %v604_v42 = vpack.c.bf16 %v123_v38, %v122_v37  ;;  %v42_v43 = vld [vmem:[#allocation2 + $0x10] sm:$0xff] }
  0x40   :  { %561 = vmatpush3.bf16.msra.mxu0 %v560_v10  ;;  %v606_v44 = vpack.c.bf16 %v141_v40, %v140_v39  ;;  %v124_v45 = vld [vmem:[#allocation5 + $0x210] sm:$0xff]  ;;  %v125_v46 = vld [vmem:[#allocation5 + $0x218] sm:$0xff]  ;;  %v142_v47 = vld [vmem:[#allocation5 + $0x2a0] sm:$0xff] }
  0x41   :  { %593 = vmatpush3.bf16.msra.mxu1 %v592_v13  ;;  %563 = vmatprep.subr.bf16.mxu0 %v562_v14  ;;  %v143_v48 = vld [vmem:[#allocation5 + $0x2a8] sm:$0xff]  ;;  %v608_v50 = vpack.c.bf16 %v125_v46, %v124_v45  ;;  %v49_v51 = vld [vmem:[#allocation2 + $0x48] sm:$0xff]  ;;  %v46_v52 = vld [vmem:[#allocation2 + $0x30] sm:$0xff] }
  0x42   :  { %595 = vmatprep.subr.bf16.mxu1 %v594_v18  ;;  %v47_v49 = vld [vmem:[#allocation2 + $0x38] sm:$0xff]  ;;  %v610_v53 = vpack.c.bf16 %v143_v48, %v142_v47  ;;  %v126_v54 = vld [vmem:[#allocation5 + $0x220] sm:$0xff]  ;;  %v48_v56 = vld [vmem:[#allocation2 + $0x40] sm:$0xff] }
  0x43   :  { %v127_v55 = vld [vmem:[#allocation5 + $0x228] sm:$0xff]  ;;  %v144_v57 = vld [vmem:[#allocation5 + $0x2b0] sm:$0xff]  ;;  %v145_v58 = vld [vmem:[#allocation5 + $0x2b8] sm:$0xff] }
  0x44   :  { %565 = vmatpush3.bf16.msra.mxu0 %v564_v24  ;;  %v53_v59 = vld [vmem:[#allocation2 + $0x68] sm:$0xff]  ;;  %v612_v60 = vpack.c.bf16 %v127_v55, %v126_v54  ;;  %v55_v61 = vld [vmem:[#allocation2 + $0x78] sm:$0xff]  ;;  %v52_v62 = vld [vmem:[#allocation2 + $0x60] sm:$0xff]  ;;  %v614_v63 = vpack.c.bf16 %v145_v58, %v144_v57 }
  0x45   :  { %597 = vmatpush3.bf16.msra.mxu1 %v596_v25  ;;  %567 = vmatprep.subr.bf16.mxu0 %v566_v26  ;;  %v128_v0 = vld [vmem:[#allocation5 + $0x230] sm:$0xff]  ;;  %v129_v1 = vld [vmem:[#allocation5 + $0x238] sm:$0xff]  ;;  %v54_v2 = vld [vmem:[#allocation2 + $0x70] sm:$0xff] }
  0x46   :  { %599 = vmatprep.subr.bf16.mxu1 %v598_v30  ;;  %v146_v3 = vld [vmem:[#allocation5 + $0x2c0] sm:$0xff]  ;;  %v147_v4 = vld [vmem:[#allocation5 + $0x2c8] sm:$0xff]  ;;  %v45_v5 = vld [vmem:[#allocation2 + $0x28] sm:$0xff]  ;;  %v616_v6 = vpack.c.bf16 %v129_v1, %v128_v0 }
  0x47   :  { %v51_v7 = vld [vmem:[#allocation2 + $0x58] sm:$0xff]  ;;  %v618_v8 = vpack.c.bf16 %v147_v4, %v146_v3  ;;  %v130_v9 = vld [vmem:[#allocation5 + $0x240] sm:$0xff]  ;;  %v148_v11 = vld [vmem:[#allocation5 + $0x2d0] sm:$0xff] }
  0x48   :  { %569 = vmatpush3.bf16.msra.mxu0 %v568_v34  ;;  %v131_v10 = vld [vmem:[#allocation5 + $0x248] sm:$0xff]  ;;  %v149_v12 = vld [vmem:[#allocation5 + $0x2d8] sm:$0xff]  ;;  %v132_v15 = vld [vmem:[#allocation5 + $0x250] sm:$0xff] }
  0x49   :  { %601 = vmatpush3.bf16.msra.mxu1 %v600_v35  ;;  %603 = vmatprep.subr.bf16.mxu0 %v602_v36  ;;  %v620_v13 = vpack.c.bf16 %v131_v10, %v130_v9  ;;  %v622_v14 = vpack.c.bf16 %v149_v12, %v148_v11  ;;  %v133_v16 = vld [vmem:[#allocation5 + $0x258] sm:$0xff]  ;;  %v150_v17 = vld [vmem:[#allocation5 + $0x2e0] sm:$0xff]  ;;  %v151_v18 = vld [vmem:[#allocation5 + $0x2e8] sm:$0xff] }
  0x4a   :  { %634 = vmatprep.subr.bf16.mxu1 %v602_v36  ;;  %v624_v19 = vpack.c.bf16 %v133_v16, %v132_v15  ;;  %v626_v20 = vpack.c.bf16 %v151_v18, %v150_v17  ;;  %v134_v21 = vld [vmem:[#allocation5 + $0x260] sm:$0xff]  ;;  %v135_v22 = vld [vmem:[#allocation5 + $0x268] sm:$0xff]  ;;  %v152_v23 = vld [vmem:[#allocation5 + $0x2f0] sm:$0xff] }
  0x4b   :  { %219 = vmatmul.mubr.f32.vlgmr.msra.gmra.mrb[0].mxu0 %v40_v41  ;;  %v153_v24 = vld [vmem:[#allocation5 + $0x2f8] sm:$0xff]  ;;  %v628_v25 = vpack.c.bf16 %v135_v22, %v134_v21  ;;  %v136_v27 = vld [vmem:[#allocation5 + $0x270] sm:$0xff]  ;;  %v50_v31 = vld [vmem:[#allocation2 + $0x50] sm:$0xff] }
  0x4c   :  { %299 = vmatmul.mubr.f32.vlgmr.msra.gmra.mrb[0].mxu1 %v42_v43  ;;  %605 = vmatpush3.bf16.msra.mxu0 %v604_v42  ;;  %v630_v26 = vpack.c.bf16 %v153_v24, %v152_v23  ;;  %v137_v28 = vld [vmem:[#allocation5 + $0x278] sm:$0xff]  ;;  %v44_v30 = vld [vmem:[#allocation2 + $0x20] sm:$0xff] }
  0x4d   :  { %642 = vmatpush3.bf16.msra.mxu1 %v604_v42  ;;  %607 = vmatprep.subr.bf16.mxu0 %v606_v44  ;;  %v632_v29 = vpack.c.bf16 %v137_v28, %v136_v27  ;;  %v57_v32 = vld [vmem:[#allocation2 + $0x88] sm:$0xff]  ;;  %v56_v33 = vld [vmem:[#allocation2 + $0x80] sm:$0xff] }
  0x4e   :  { %635 = vmatprep.subr.bf16.mxu1 %v606_v44  ;;  %223 = vmatprep.mubr.f32.mxu0 %v47_v49 }
  0x4f   :  { %303 = vmatprep.mubr.f32.mxu1 %v49_v51  ;;  %224 = vmatmul.mubr.f32.gmra.mrb[2].mxu0 %v46_v52 }
  0x50   :  { %609 = vmatpush3.bf16.msra.mxu0 %v608_v50  ;;  %304 = vmatmul.mubr.f32.gmra.mrb[2].mxu1 %v48_v56 }
  0x51   :  { %643 = vmatpush3.bf16.msra.mxu1 %v608_v50  ;;  %611 = vmatprep.subr.bf16.mxu0 %v610_v53 }
  0x52   :  { %636 = vmatprep.subr.bf16.mxu1 %v610_v53  ;;  %228 = vmatprep.mubr.f32.mxu0 %v53_v59 }
  0x53   :  { %308 = vmatprep.mubr.f32.mxu1 %v55_v61  ;;  %229 = vmatmul.mubr.f32.gmra.mrb[4].mxu0 %v52_v62 }
  0x54   :  { %613 = vmatpush3.bf16.msra.mxu0 %v612_v60  ;;  %309 = vmatmul.mubr.f32.gmra.mrb[4].mxu1 %v54_v2 }
  0x55   :  { %644 = vmatpush3.bf16.msra.mxu1 %v612_v60  ;;  %615 = vmatprep.subr.bf16.mxu0 %v614_v63 }
  0x56   :  { %637 = vmatprep.subr.bf16.mxu1 %v614_v63  ;;  %378 = vmatprep.mubr.f32.mxu0 %v45_v5 }
  0x57   :  { %383 = vmatprep.mubr.f32.mxu1 %v51_v7 }
  0x58   :  { %617 = vmatpush3.bf16.msra.mxu0 %v616_v6 }
  0x59   :  { %645 = vmatpush3.bf16.msra.mxu1 %v616_v6  ;;  %619 = vmatprep.subr.bf16.mxu0 %v618_v8 }
  0x5a   :  { %638 = vmatprep.subr.bf16.mxu1 %v618_v8 }
  0x5c   :  { %621 = vmatpush3.bf16.msra.mxu0 %v620_v13 }
  0x5d   :  { %646 = vmatpush3.bf16.msra.mxu1 %v620_v13  ;;  %623 = vmatprep.subr.bf16.mxu0 %v622_v14 }
  0x5e   :  { %639 = vmatprep.subr.bf16.mxu1 %v622_v14 }
  0x60   :  { %625 = vmatpush3.bf16.msra.mxu0 %v624_v19 }
  0x61   :  { %647 = vmatpush3.bf16.msra.mxu1 %v624_v19  ;;  %627 = vmatprep.subr.bf16.mxu0 %v626_v20 }
  0x62   :  { %640 = vmatprep.subr.bf16.mxu1 %v626_v20 }
  0x64   :  { %629 = vmatpush3.bf16.msra.mxu0 %v628_v25 }
  0x65   :  { %648 = vmatpush3.bf16.msra.mxu1 %v628_v25  ;;  %631 = vmatprep.subr.bf16.mxu0 %v630_v26 }
  0x66   :  { %641 = vmatprep.subr.bf16.mxu1 %v630_v26 }
  0x68   :  { %633 = vmatpush3.bf16.msra.mxu0 %v632_v29 }
  0x69   :  { %649 = vmatpush3.bf16.msra.mxu1 %v632_v29 }
  0x6b   :  { %379 = vmatmul.mubr.f32.vlgmr.msra.gmra.mrb[6].mxu0 %v44_v30 }
  0x6c   :  { %384 = vmatmul.mubr.f32.vlgmr.msra.gmra.mrb[6].mxu1 %v50_v31 }
  0x6d   :  { %388 = vmatprep.mubr.f32.mxu1 %v57_v32 }
  0x70   :  { %389 = vmatmul.mubr.f32.gmra.mrb[8].mxu1 %v56_v33 }
 0x11e   :  { %v447_v34 = vpop.f32.mrb[0].mxu0 }
 0x11f   :  { %v488_v35 = vpop.f32.mrb[0].mxu1  ;;  %v448_v36 = vpop.f32.mrb[1].mxu0 }
 0x120   :  { %v449_v37 = vadd.f32 %v448_v36, %v447_v34  ;;  %v489_v38 = vpop.f32.mrb[1].mxu1 }
 0x121   :  { %v490_v39 = vadd.f32 %v489_v38, %v488_v35 }
 0x122   :  { %v450_v40 = vpop.f32.mrb[2].mxu0 }
 0x123   :  { %v301_v41 = vadd.f32 %v490_v39, %v449_v37  ;;  %v491_v42 = vpop.f32.mrb[2].mxu1  ;;  %v451_v43 = vpop.f32.mrb[3].mxu0 }
 0x124   :  { %v452_v44 = vadd.f32 %v451_v43, %v450_v40  ;;  %v492_v45 = vpop.f32.mrb[3].mxu1 }
 0x125   :  { %v493_v46 = vadd.f32 %v492_v45, %v491_v42 }
 0x126   :  { %v453_v47 = vpop.f32.mrb[4].mxu0 }
 0x127   :  { %v306_v48 = vadd.f32 %v493_v46, %v452_v44  ;;  %v494_v49 = vpop.f32.mrb[4].mxu1  ;;  %v454_v50 = vpop.f32.mrb[5].mxu0 }
 0x128   :  { %v455_v51 = vadd.f32 %v454_v50, %v453_v47  ;;  %v495_v52 = vpop.f32.mrb[5].mxu1 }
 0x129   :  { %v496_v53 = vadd.f32 %v495_v52, %v494_v49 }
 0x12b   :  { %v311_v54 = vadd.f32 %v496_v53, %v455_v51 }
 0x13e   :  { %v529_v55 = vpop.f32.mrb[6].mxu0 }
 0x13f   :  { %v532_v56 = vpop.f32.mrb[6].mxu1  ;;  %v530_v57 = vpop.f32.mrb[7].mxu0 }
 0x140   :  { %v531_v58 = vadd.f32 %v530_v57, %v529_v55  ;;  %v533_v59 = vpop.f32.mrb[7].mxu1 }
 0x141   :  { %v534_v60 = vadd.f32 %v533_v59, %v532_v56 }
 0x142   :  { %v381_v61 = vadd.f32 %v531_v58, %v301_v41 }
 0x143   :  { %v386_v62 = vadd.f32 %v534_v60, %v306_v48  ;;  %v535_v63 = vpop.f32.mrb[8].mxu1 }
 0x144   :  { %394 = vst [vmem:[#allocation7] sm:$0xff] %v381_v61  ;;  %v536_v0 = vpop.f32.mrb[9].mxu1 }
 0x145   :  { %395 = vst [vmem:[#allocation7 + $0x8] sm:$0xff] %v386_v62  ;;  %v537_v1 = vadd.f32 %v536_v0, %v535_v63 }
 0x147   :  { %v391_v2 = vadd.f32 %v537_v1, %v311_v54 }
 0x149   :  { %396 = vst [vmem:[#allocation7 + $0x10] sm:$0xff] %v391_v2 }
 0x14a   :  { %712 = shalt.err (!%p709_p6)
}
 0x14b   :  { %s713_s12 = scalar_lea.hbm %s795_s2, 384 }
 0x14c   :  { %p714_p7 = scmp.ne.s32.totalorder %s795_s2, %s713_s12  ;;  %p717_p8 = scmp.lt.u32.totalorder %s713_s12, %s795_s2 }
 0x14e   :  { %p719_p9 = pnand %p717_p8, %p714_p7 }
 0x150   :  { %722 = shalt.err (!%p719_p9)
}
 0x151   :  { %408 = dma.vmem_to_hbm [thread:$0]  %s403_s8, 384, %s795_s2, [#allocation4], %s733_s0, %s733_s0, %s734_s5  }
 0x152   :  { %727 = dma.done.wait [#allocation4], 384  }
 0x153   :  { %728 = vsyncadd [#allocation4], 4294966912 }
 0x154   :  { %412 = vsyncpa [#allocation3], 1 }
 0x155   :  { %413 = vsyncpa [#allocation6], 1 }
 0x156   :  { %414 = vsyncpa [#allocation4], 1 }

</bundles_post_ra>
